<compile_context>
chip_gen: v7x
topology: tpu7x:2x2x1
jax: 0.10.0
libtpu: 0.0.40
codegen_flags: <defaults>
</compile_context>

<pallas_src>
import jax
import jax.numpy as jnp
from jax.experimental import pallas as pl
from jax.experimental.pallas import tpu as pltpu

BN_EPS = 1e-5


def _projection_kernel(x_ref, w1_ref, g1_ref, be1_ref,
                       w3_ref, g3_ref, be3_ref, out_ref, acc_ref):
    k = pl.program_id(0)

    @pl.when(k == 0)
    def _init():
        acc_ref[...] = jnp.zeros_like(acc_ref)

    n = x_ref.shape[0]
    inv_n = 1.0 / n

    # ---- layer1 (this hidden tile): Linear (bias cancels under BN) -> BN -> ReLU ----
    h = jnp.dot(x_ref[...], w1_ref[...],
                preferred_element_type=jnp.float32)          # [N, th] f32 (bf16 MXU inputs)
    s1 = jnp.sum(h, axis=0, keepdims=True)
    q1 = jnp.sum(h * h, axis=0, keepdims=True)
    mean1 = s1 * inv_n
    var1 = q1 * inv_n - mean1 * mean1                        # biased variance (PyTorch BN)
    scale1 = g1_ref[...] * jax.lax.rsqrt(var1 + BN_EPS)
    shift1 = be1_ref[...] - mean1 * scale1
    h = jnp.maximum(h * scale1 + shift1, 0.0)

    # ---- layer3 partial: z += h_tile @ W3_tile (f32 accumulator in VMEM scratch) ----
    acc_ref[...] += jnp.dot(h.astype(w3_ref.dtype), w3_ref[...],
                            preferred_element_type=jnp.float32)

    # ---- finalize on last hidden tile: BN3 over the full z, no ReLU ----
    @pl.when(k == pl.num_programs(0) - 1)
    def _finalize():
        z = acc_ref[...]
        s3 = jnp.sum(z, axis=0, keepdims=True)
        q3 = jnp.sum(z * z, axis=0, keepdims=True)
        mean3 = s3 * inv_n
        var3 = q3 * inv_n - mean3 * mean3
        scale3 = g3_ref[...] * jax.lax.rsqrt(var3 + BN_EPS)
        shift3 = be3_ref[...] - mean3 * scale3
        out_ref[...] = (z * scale3 + shift3).astype(out_ref.dtype)


def _pick_hidden_tile(hidden_dim):
    for th in (512, 256, 128):
        if hidden_dim % th == 0:
            return th
    return hidden_dim  # small / unaligned hidden: single full-dim tile (always legal)


def projection_2mlp(x, params, *, hidden_tile=None):
    """x: [N, in_dim] float32.  params: dict from init_params (b1/b3 are ignored:
    they cancel exactly under training-mode BatchNorm)."""
    n, in_dim = x.shape
    hidden_dim = params["w1"].shape[1]
    out_dim = params["w3"].shape[1]
    th = hidden_tile if hidden_tile is not None else _pick_hidden_tile(hidden_dim)
    assert hidden_dim % th == 0
    grid = (hidden_dim // th,)

    # bf16 MXU operands, f32 accumulation / BN math.
    xb = x.astype(jnp.bfloat16)
    w1 = params["w1"].astype(jnp.bfloat16)
    w3 = params["w3"].astype(jnp.bfloat16)
    g1, be1 = params["g1"], params["be1"]
    g3, be3 = params["g3"], params["be3"]

    flops = 2 * n * (in_dim * hidden_dim + hidden_dim * out_dim)
    bytes_accessed = (xb.size * 2 + w1.size * 2 + w3.size * 2
                      + (g1.size + be1.size + g3.size + be3.size) * 4
                      + n * out_dim * 4)

    grid_spec = pltpu.PrefetchScalarGridSpec(
        num_scalar_prefetch=0,
        grid=grid,
        in_specs=[
            pl.BlockSpec((n, in_dim), lambda k: (0, 0)),     # x, resident across the grid
            pl.BlockSpec((in_dim, th), lambda k: (0, k)),    # W1 hidden tile (pipelined)
            pl.BlockSpec((1, th), lambda k: (0, k)),         # gamma1 tile
            pl.BlockSpec((1, th), lambda k: (0, k)),         # beta1 tile
            pl.BlockSpec((th, out_dim), lambda k: (k, 0)),   # W3 hidden tile (pipelined)
            pl.BlockSpec((1, out_dim), lambda k: (0, 0)),    # gamma3
            pl.BlockSpec((1, out_dim), lambda k: (0, 0)),    # beta3
        ],
        out_specs=pl.BlockSpec((n, out_dim), lambda k: (0, 0)),
        scratch_shapes=[pltpu.VMEM((n, out_dim), jnp.float32)],
    )

    return pl.pallas_call(
        _projection_kernel,
        out_shape=jax.ShapeDtypeStruct((n, out_dim), jnp.float32),
        grid_spec=grid_spec,
        compiler_params=pltpu.CompilerParams(
            # hidden-tile axis is a reduction (z accumulation) -> arbitrary.
            dimension_semantics=("arbitrary",)),
        cost_estimate=pl.CostEstimate(flops=flops, transcendentals=0,
                                      bytes_accessed=bytes_accessed),
    )(xb, w1, g1, be1, w3, g3, be3)


def init_params(key, in_dim, hidden_dim, out_dim):
    """Deterministic synthetic parameters (shapes match the PyTorch module)."""
    k1, k2, k3, k4 = jax.random.split(key, 4)
    # Linear weights stored pre-transposed as [in, out]; per-feature vectors as [1, out].
    w1 = (jax.random.normal(k1, (in_dim, hidden_dim), jnp.float32)
          * (1.0 / jnp.sqrt(in_dim)))
    b1 = jax.random.normal(k2, (1, hidden_dim), jnp.float32) * 0.01
    w3 = (jax.random.normal(k3, (hidden_dim, out_dim), jnp.float32)
          * (1.0 / jnp.sqrt(hidden_dim)))
    b3 = jax.random.normal(k4, (1, out_dim), jnp.float32) * 0.01
    # BatchNorm affine params at PyTorch init values (gamma=1, beta=0).
    g1 = jnp.ones((1, hidden_dim), jnp.float32)
    be1 = jnp.zeros((1, hidden_dim), jnp.float32)
    g3 = jnp.ones((1, out_dim), jnp.float32)
    be3 = jnp.zeros((1, out_dim), jnp.float32)
    return dict(w1=w1, b1=b1, g1=g1, be1=be1, w3=w3, b3=b3, g3=g3, be3=be3)


def _reference(x, p):
    """Plain-JAX reference of the same forward pass (training-mode BN).

    Includes the Linear biases (which the kernel drops because they cancel under BN)
    and uses the same bf16-operand / f32-accumulation matmuls as the kernel."""
    xb = x.astype(jnp.bfloat16)
    w1 = p["w1"].astype(jnp.bfloat16)
    w3 = p["w3"].astype(jnp.bfloat16)

    h = jnp.dot(xb, w1, preferred_element_type=jnp.float32) + p["b1"]
    m = h.mean(0, keepdims=True)
    v = ((h - m) ** 2).mean(0, keepdims=True)
    h = jnp.maximum((h - m) * jax.lax.rsqrt(v + BN_EPS) * p["g1"] + p["be1"], 0.0)

    z = jnp.dot(h.astype(jnp.bfloat16), w3, preferred_element_type=jnp.float32) + p["b3"]
    m3 = z.mean(0, keepdims=True)
    v3 = ((z - m3) ** 2).mean(0, keepdims=True)
    return (z - m3) * jax.lax.rsqrt(v3 + BN_EPS) * p["g3"] + p["be3"]


if __name__ == "__main__":
    key = jax.random.PRNGKey(0)
    kx, kp = jax.random.split(key)

    # Small, lane-aligned shapes consistent with the module's [batch, features] forward
    # (hidden split into two 128-wide tiles so the pipelined grid is actually exercised).
    batch, in_dim, hidden_dim, out_dim = 16, 128, 256, 128

    x = jax.random.normal(kx, (batch, in_dim), jnp.float32)
    params = init_params(kp, in_dim, hidden_dim, out_dim)

    out = projection_2mlp(x, params)
    out = jax.block_until_ready(out)

    ref = _reference(x, params)
    assert out.shape == (batch, out_dim)
    err = float(jnp.max(jnp.abs(out - ref)))
    assert jnp.allclose(out, ref, atol=1e-2, rtol=1e-2), f"max abs err = {err}"

    print("KERNEL_OK")
</pallas_src>

<mosaic_0001>
module attributes {stable_mosaic.version = 11 : i64} {
  func.func @_projection_kernel(%arg0: i32, %arg1: memref<16x128xbf16, #tpu.memory_space<vmem>>, %arg2: memref<128x256xbf16, #tpu.memory_space<vmem>>, %arg3: memref<1x256xf32, #tpu.memory_space<vmem>>, %arg4: memref<1x256xf32, #tpu.memory_space<vmem>>, %arg5: memref<256x128xbf16, #tpu.memory_space<vmem>>, %arg6: memref<1x128xf32, #tpu.memory_space<vmem>>, %arg7: memref<1x128xf32, #tpu.memory_space<vmem>>, %arg8: memref<16x128xf32, #tpu.memory_space<vmem>>, %arg9: memref<16x128xf32, #tpu.memory_space<vmem>>) attributes {dimension_semantics = [#tpu.dimension_semantics<arbitrary>], iteration_bounds = array<i64: 1>, scalar_prefetch = 0 : i64, scratch_operands = 1 : i64, tpu.core_type = #tpu.core_type<tc>, window_params = [{pipeline_mode = #tpu.pipeline_mode<synchronous>, transform_indices = @transform_0, window_bounds = array<i64: 16, 128>}, {transform_indices = @transform_1, window_bounds = array<i64: 128, 256>}, {transform_indices = @transform_2, window_bounds = array<i64: 1, 256>}, {transform_indices = @transform_3, window_bounds = array<i64: 1, 256>}, {transform_indices = @transform_4, window_bounds = array<i64: 256, 128>}, {pipeline_mode = #tpu.pipeline_mode<synchronous>, transform_indices = @transform_5, window_bounds = array<i64: 1, 128>}, {pipeline_mode = #tpu.pipeline_mode<synchronous>, transform_indices = @transform_6, window_bounds = array<i64: 1, 128>}, {pipeline_mode = #tpu.pipeline_mode<synchronous>, transform_indices = @transform_7, window_bounds = array<i64: 16, 128>}]} {
    %c0_i32 = arith.constant 0 : i32
    %0 = arith.cmpi eq, %arg0, %c0_i32 : i32
    %1 = arith.extui %0 : i1 to i32
    %c0_i32_0 = arith.constant 0 : i32
    %2 = arith.cmpi ne, %1, %c0_i32_0 : i32
    scf.if %2 {
      %cst_23 = arith.constant 0.000000e+00 : f32
      %40 = vector.broadcast %cst_23 : f32 to vector<16x128xf32>
      %c0_24 = arith.constant 0 : index
      %c0_25 = arith.constant 0 : index
      %41 = vector.load %arg9[%c0_24, %c0_25] : memref<16x128xf32, #tpu.memory_space<vmem>>, vector<16x128xf32>
      tpu.vector_store %arg9[%c0_24, %c0_25], %40 {strides = array<i32>} : memref<16x128xf32, #tpu.memory_space<vmem>>, vector<16x128xf32>,
    } else {
    }
    %c0 = arith.constant 0 : index
    %c0_1 = arith.constant 0 : index
    %3 = vector.load %arg1[%c0, %c0_1] : memref<16x128xbf16, #tpu.memory_space<vmem>>, vector<16x128xbf16>
    %c0_2 = arith.constant 0 : index
    %c0_3 = arith.constant 0 : index
    %4 = vector.load %arg2[%c0_2, %c0_3] : memref<128x256xbf16, #tpu.memory_space<vmem>>, vector<128x256xbf16>
    %cst = arith.constant dense<0.000000e+00> : vector<16x256xf32>
    %5 = tpu.matmul %3, %4, %cst {dimension_numbers = #tpu.dot_dimension_numbers<[1], [0], [0], [1], [0, 0, 1, 1], [], []>} : vector<16x128xbf16>, vector<128x256xbf16>, vector<16x256xf32> -> vector<16x256xf32>
    %cst_4 = arith.constant dense<0.000000e+00> : vector<256xf32>
    %6 = vector.multi_reduction <add>, %5, %cst_4 [0] : vector<16x256xf32> to vector<256xf32>
    %7 = vector.shape_cast %6 : vector<256xf32> to vector<1x256xf32>
    %8 = arith.mulf %5, %5 : vector<16x256xf32>
    %cst_5 = arith.constant dense<0.000000e+00> : vector<256xf32>
    %9 = vector.multi_reduction <add>, %8, %cst_5 [0] : vector<16x256xf32> to vector<256xf32>
    %10 = vector.shape_cast %9 : vector<256xf32> to vector<1x256xf32>
    %cst_6 = arith.constant 6.250000e-02 : f32
    %11 = vector.broadcast %cst_6 : f32 to vector<1x256xf32>
    %12 = arith.mulf %7, %11 : vector<1x256xf32>
    %cst_7 = arith.constant 6.250000e-02 : f32
    %13 = vector.broadcast %cst_7 : f32 to vector<1x256xf32>
    %14 = arith.mulf %10, %13 : vector<1x256xf32>
    %15 = arith.mulf %12, %12 : vector<1x256xf32>
    %16 = arith.subf %14, %15 : vector<1x256xf32>
    %c0_8 = arith.constant 0 : index
    %c0_9 = arith.constant 0 : index
    %17 = vector.load %arg3[%c0_8, %c0_9] : memref<1x256xf32, #tpu.memory_space<vmem>>, vector<1x256xf32>
    %cst_10 = arith.constant 9.99999974E-6 : f32
    %18 = vector.broadcast %cst_10 : f32 to vector<1x256xf32>
    %19 = arith.addf %16, %18 : vector<1x256xf32>
    %20 = math.rsqrt %19 : vector<1x256xf32>
    %21 = arith.mulf %17, %20 : vector<1x256xf32>
    %c0_11 = arith.constant 0 : index
    %c0_12 = arith.constant 0 : index
    %22 = vector.load %arg4[%c0_11, %c0_12] : memref<1x256xf32, #tpu.memory_space<vmem>>, vector<1x256xf32>
    %23 = arith.mulf %12, %21 : vector<1x256xf32>
    %24 = arith.subf %22, %23 : vector<1x256xf32>
    %25 = vector.broadcast %21 : vector<1x256xf32> to vector<16x256xf32>
    %26 = arith.mulf %5, %25 : vector<16x256xf32>
    %27 = vector.broadcast %24 : vector<1x256xf32> to vector<16x256xf32>
    %28 = arith.addf %26, %27 : vector<16x256xf32>
    %cst_13 = arith.constant 0.000000e+00 : f32
    %29 = vector.broadcast %cst_13 : f32 to vector<16x256xf32>
    %30 = arith.maximumf %28, %29 : vector<16x256xf32>
    %c0_14 = arith.constant 0 : index
    %c0_15 = arith.constant 0 : index
    %31 = vector.load %arg9[%c0_14, %c0_15] : memref<16x128xf32, #tpu.memory_space<vmem>>, vector<16x128xf32>
    %32 = arith.truncf %30 : vector<16x256xf32> to vector<16x256xbf16>
    %c0_16 = arith.constant 0 : index
    %c0_17 = arith.constant 0 : index
    %33 = vector.load %arg5[%c0_16, %c0_17] : memref<256x128xbf16, #tpu.memory_space<vmem>>, vector<256x128xbf16>
    %cst_18 = arith.constant dense<0.000000e+00> : vector<16x128xf32>
    %34 = tpu.matmul %32, %33, %cst_18 {dimension_numbers = #tpu.dot_dimension_numbers<[1], [0], [0], [1], [0, 0, 1, 1], [], []>} : vector<16x256xbf16>, vector<256x128xbf16>, vector<16x128xf32> -> vector<16x128xf32>
    %35 = arith.addf %31, %34 : vector<16x128xf32>
    %c0_19 = arith.constant 0 : index
    %c0_20 = arith.constant 0 : index
    %36 = vector.load %arg9[%c0_19, %c0_20] : memref<16x128xf32, #tpu.memory_space<vmem>>, vector<16x128xf32>
    tpu.vector_store %arg9[%c0_19, %c0_20], %35 {strides = array<i32>} : memref<16x128xf32, #tpu.memory_space<vmem>>, vector<16x128xf32>,
    %c0_i32_21 = arith.constant 0 : i32
    %37 = arith.cmpi eq, %arg0, %c0_i32_21 : i32
    %38 = arith.extui %37 : i1 to i32
    %c0_i32_22 = arith.constant 0 : i32
    %39 = arith.cmpi ne, %38, %c0_i32_22 : i32
    scf.if %39 {
      %c0_23 = arith.constant 0 : index
      %c0_24 = arith.constant 0 : index
      %40 = vector.load %arg9[%c0_23, %c0_24] : memref<16x128xf32, #tpu.memory_space<vmem>>, vector<16x128xf32>
      %cst_25 = arith.constant dense<0.000000e+00> : vector<128xf32>
      %41 = vector.multi_reduction <add>, %40, %cst_25 [0] : vector<16x128xf32> to vector<128xf32>
      %42 = vector.shape_cast %41 : vector<128xf32> to vector<1x128xf32>
      %43 = arith.mulf %40, %40 : vector<16x128xf32>
      %cst_26 = arith.constant dense<0.000000e+00> : vector<128xf32>
      %44 = vector.multi_reduction <add>, %43, %cst_26 [0] : vector<16x128xf32> to vector<128xf32>
      %45 = vector.shape_cast %44 : vector<128xf32> to vector<1x128xf32>
      %cst_27 = arith.constant 6.250000e-02 : f32
      %46 = vector.broadcast %cst_27 : f32 to vector<1x128xf32>
      %47 = arith.mulf %42, %46 : vector<1x128xf32>
      %cst_28 = arith.constant 6.250000e-02 : f32
      %48 = vector.broadcast %cst_28 : f32 to vector<1x128xf32>
      %49 = arith.mulf %45, %48 : vector<1x128xf32>
      %50 = arith.mulf %47, %47 : vector<1x128xf32>
      %51 = arith.subf %49, %50 : vector<1x128xf32>
      %c0_29 = arith.constant 0 : index
      %c0_30 = arith.constant 0 : index
      %52 = vector.load %arg6[%c0_29, %c0_30] : memref<1x128xf32, #tpu.memory_space<vmem>>, vector<1x128xf32>
      %cst_31 = arith.constant 9.99999974E-6 : f32
      %53 = vector.broadcast %cst_31 : f32 to vector<1x128xf32>
      %54 = arith.addf %51, %53 : vector<1x128xf32>
      %55 = math.rsqrt %54 : vector<1x128xf32>
      %56 = arith.mulf %52, %55 : vector<1x128xf32>
      %c0_32 = arith.constant 0 : index
      %c0_33 = arith.constant 0 : index
      %57 = vector.load %arg7[%c0_32, %c0_33] : memref<1x128xf32, #tpu.memory_space<vmem>>, vector<1x128xf32>
      %58 = arith.mulf %47, %56 : vector<1x128xf32>
      %59 = arith.subf %57, %58 : vector<1x128xf32>
      %60 = vector.broadcast %56 : vector<1x128xf32> to vector<16x128xf32>
      %61 = arith.mulf %40, %60 : vector<16x128xf32>
      %62 = vector.broadcast %59 : vector<1x128xf32> to vector<16x128xf32>
      %63 = arith.addf %61, %62 : vector<16x128xf32>
      %c0_34 = arith.constant 0 : index
      %c0_35 = arith.constant 0 : index
      %64 = vector.load %arg8[%c0_34, %c0_35] : memref<16x128xf32, #tpu.memory_space<vmem>>, vector<16x128xf32>
      tpu.vector_store %arg8[%c0_34, %c0_35], %63 {strides = array<i32>} : memref<16x128xf32, #tpu.memory_space<vmem>>, vector<16x128xf32>,
    } else {
    }
    return
  }
  func.func @transform_0(%arg0: i32) -> (i32, i32) {
    %c0_i32 = arith.constant 0 : i32
    %c0_i32_0 = arith.constant 0 : i32
    %c0_i32_1 = arith.constant 0 : i32
    return %c0_i32, %c0_i32_0 : i32, i32
  }
  func.func @transform_1(%arg0: i32) -> (i32, i32) {
    %c0_i32 = arith.constant 0 : i32
    %c0_i32_0 = arith.constant 0 : i32
    return %c0_i32, %arg0 : i32, i32
  }
  func.func @transform_2(%arg0: i32) -> (i32, i32) {
    %c0_i32 = arith.constant 0 : i32
    %c0_i32_0 = arith.constant 0 : i32
    return %c0_i32, %arg0 : i32, i32
  }
  func.func @transform_3(%arg0: i32) -> (i32, i32) {
    %c0_i32 = arith.constant 0 : i32
    %c0_i32_0 = arith.constant 0 : i32
    return %c0_i32, %arg0 : i32, i32
  }
  func.func @transform_4(%arg0: i32) -> (i32, i32) {
    %c0_i32 = arith.constant 0 : i32
    %c0_i32_0 = arith.constant 0 : i32
    return %arg0, %c0_i32 : i32, i32
  }
  func.func @transform_5(%arg0: i32) -> (i32, i32) {
    %c0_i32 = arith.constant 0 : i32
    %c0_i32_0 = arith.constant 0 : i32
    %c0_i32_1 = arith.constant 0 : i32
    return %c0_i32, %c0_i32_0 : i32, i32
  }
  func.func @transform_6(%arg0: i32) -> (i32, i32) {
    %c0_i32 = arith.constant 0 : i32
    %c0_i32_0 = arith.constant 0 : i32
    %c0_i32_1 = arith.constant 0 : i32
    return %c0_i32, %c0_i32_0 : i32, i32
  }
  func.func @transform_7(%arg0: i32) -> (i32, i32) {
    %c0_i32 = arith.constant 0 : i32
    %c0_i32_0 = arith.constant 0 : i32
    %c0_i32_1 = arith.constant 0 : i32
    return %c0_i32, %c0_i32_0 : i32, i32
  }
}

</mosaic_0001>

<bundles_post_ra>
// kernel: tpu_custom_call.1
= control target key start
LH: loop header
LB: loop body
LE: loop exit
PB: predicated region body
PF: predicated region fallthrough
CT: control target
= control target key end

     0   :  { %12 = vsyncpa [#allocation4], 0  ;;  %s933_s0 = inlined_call_operand.hbm [shape: bf16[16,128], index: 0, kind: input, shape index: {}]   ;;  %s934_s1 = inlined_call_operand.hbm [shape: bf16[128,256], index: 1, kind: input, shape index: {}]   ;;  %s935_s2 = inlined_call_operand.vmem [shape: f32[1,256], index: 2, kind: input, shape index: {}]   ;;  %s936_s3 = inlined_call_operand.vmem [shape: f32[1,256], index: 3, kind: input, shape index: {}]   ;;  %s937_s4 = inlined_call_operand.hbm [shape: bf16[256,128], index: 4, kind: input, shape index: {}]   ;;  %s938_s5 = inlined_call_operand.vmem [shape: f32[1,128], index: 5, kind: input, shape index: {}]   ;;  %s939_s6 = inlined_call_operand.vmem [shape: f32[1,128], index: 6, kind: input, shape index: {}]   ;;  %s940_s7 = inlined_call_operand.hbm [shape: f32[16,128], index: 7, kind: output, shape index: {}]  }
   0x1   :  { %13 = vsyncpa [#allocation7], 0 }
   0x2   :  { %14 = vsyncpa [#allocation5], 0  ;;  %s793_s24 = smov [#allocation6]   ;;  %s699_s28 = scalar_lea.hbm %s934_s1, 2048 }
   0x3   :  { %s32_s25 = sshll.u32 %s793_s24, 4  ;;  %p700_p0 = scmp.ne.s32.totalorder %s934_s1, %s699_s28  ;;  %s33_s25 = int_to_ptr.vmem [resolvable:$true] %s32_s25 }
   0x4   :  { %p703_p1 = scmp.lt.u32.totalorder %s699_s28, %s934_s1 }
   0x6   :  { %p705_p2 = pnand %p703_p1, %p700_p0 }
   0x8   :  { %708 = shalt.err (!%p705_p2)
}
   0x9   :  { %s709_s10 = scalar_lea.vmem %s33_s25, 2048  ;;  %p714_p4 = scmp.lt.s32.totalorder %s33_s25, %s33_s25 }
   0xa   :  { %p710_p3 = scmp.ne.s32.totalorder %s33_s25, %s709_s10  ;;  %p715_p5 = scmp.lt.s32.totalorder %s709_s10, %s709_s10 }
   0xc   :  { %p716_p6 = por %p715_p5, %p714_p4 }
   0xe   :  { %p717_p7 = pnand %p716_p6, %p710_p3 }
  0x10   :  { %720 = shalt.err (!%p717_p7)
}
  0x11   :  { %s794_s11 = smov 128   ;;  %s795_s12 = smov 8  }
  0x12   :  { %38 = dma.hbm_to_vmem [thread:$0]  %s934_s1, 2048, %s33_s25, [#allocation7], %s794_s11, %s794_s11, %s795_s12  }
  0x13   :  { %s796_s15 = smov [#allocation3]   ;;  %s721_s19 = scalar_lea.hbm %s933_s0, 128 }
  0x14   :  { %s20_s16 = sshll.u32 %s796_s15, 4  ;;  %p722_p8 = scmp.ne.s32.totalorder %s933_s0, %s721_s19  ;;  %s21_s16 = int_to_ptr.vmem [resolvable:$true] %s20_s16 }
  0x15   :  { %p725_p9 = scmp.lt.u32.totalorder %s721_s19, %s933_s0 }
  0x17   :  { %p727_p10 = pnand %p725_p9, %p722_p8 }
  0x19   :  { %730 = shalt.err (!%p727_p10)
}
  0x1a   :  { %s731_s24 = scalar_lea.vmem %s21_s16, 128  ;;  %p736_p12 = scmp.lt.s32.totalorder %s21_s16, %s21_s16 }
  0x1b   :  { %p732_p11 = scmp.ne.s32.totalorder %s21_s16, %s731_s24  ;;  %p737_p13 = scmp.lt.s32.totalorder %s731_s24, %s731_s24 }
  0x1d   :  { %p738_p0 = por %p737_p13, %p736_p12 }
  0x1f   :  { %p739_p1 = pnand %p738_p0, %p732_p11 }
  0x21   :  { %742 = shalt.err (!%p739_p1)
}
  0x22   :  { %s797_s1 = smov 64   ;;  %s798_s25 = smov 4  }
  0x23   :  { %26 = dma.hbm_to_vmem [thread:$0]  %s933_s0, 128, %s21_s16, [#allocation4], %s797_s1, %s797_s1, %s798_s25  }
  0x24   :  { %s799_s28 = smov [#allocation8]   ;;  %s743_s9 = scalar_lea.hbm %s937_s4, 2048 }
  0x25   :  { %s48_s29 = sshll.u32 %s799_s28, 4  ;;  %p744_p2 = scmp.ne.s32.totalorder %s937_s4, %s743_s9  ;;  %s49_s29 = int_to_ptr.vmem [resolvable:$true] %s48_s29 }
  0x26   :  { %p747_p3 = scmp.lt.u32.totalorder %s743_s9, %s937_s4 }
  0x28   :  { %p749_p4 = pnand %p747_p3, %p744_p2 }
  0x2a   :  { %752 = shalt.err (!%p749_p4)
}
  0x2b   :  { %s753_s17 = scalar_lea.vmem %s49_s29, 2048  ;;  %p758_p6 = scmp.lt.s32.totalorder %s49_s29, %s49_s29 }
  0x2c   :  { %p754_p5 = scmp.ne.s32.totalorder %s49_s29, %s753_s17  ;;  %p759_p7 = scmp.lt.s32.totalorder %s753_s17, %s753_s17 }
  0x2e   :  { %p760_p8 = por %p759_p7, %p758_p6 }
  0x30   :  { %p761_p9 = pnand %p760_p8, %p754_p5 }
  0x32   :  { %764 = shalt.err (!%p761_p9)
}
  0x33   :  { %54 = dma.hbm_to_vmem [thread:$0]  %s937_s4, 2048, %s49_s29, [#allocation7], %s797_s1, %s797_s1, %s798_s25  }
  0x34   :  { %787 = dma.done.wait [#allocation4], 128  }
  0x35   :  { %788 = vsyncadd [#allocation4], 4294967168 }
  0x36   :  { %789 = dma.done.wait [#allocation7], 4096  }
  0x37   :  { %790 = vsyncadd [#allocation7], 4294963200  ;;  %v800_v0 = vmov 0   ;;  %v652_v1 = vld [vmem:[#allocation6 + $0x4] ss:$8 sps:$4 sm:$0xff]   ;;  %v676_v17 = vld [vmem:[#allocation3] sm:$0xff]  }
  0x38   :  { %211 = vmatprep.mubr.bf16.mxu0 %v800_v0  ;;  %v654_v2 = vld [vmem:[#allocation6] ss:$8 sps:$4 sm:$0xff]   ;;  %179 = vmatprep.subr.bf16.mxu0 %v652_v1  ;;  %v655_v3 = vld [vmem:[#allocation6 + $0x14] ss:$8 sps:$4 sm:$0xff]   ;;  %v657_v4 = vld [vmem:[#allocation6 + $0x10] ss:$8 sps:$4 sm:$0xff]  }
  0x39   :  { %180 = vmatpush1.bf16.msra.mxu0 %v654_v2  ;;  %v658_v5 = vld [vmem:[#allocation6 + $0x24] ss:$8 sps:$4 sm:$0xff]   ;;  %v660_v6 = vld [vmem:[#allocation6 + $0x20] ss:$8 sps:$4 sm:$0xff]   ;;  %v661_v7 = vld [vmem:[#allocation6 + $0x34] ss:$8 sps:$4 sm:$0xff]  }
  0x3a   :  { %181 = vmatprep.subr.bf16.mxu0 %v655_v3  ;;  %v663_v8 = vld [vmem:[#allocation6 + $0x30] ss:$8 sps:$4 sm:$0xff]   ;;  %v664_v9 = vld [vmem:[#allocation6 + $0x44] ss:$8 sps:$4 sm:$0xff]   ;;  %v666_v10 = vld [vmem:[#allocation6 + $0x40] ss:$8 sps:$4 sm:$0xff]  }
  0x3b   :  { %v667_v11 = vld [vmem:[#allocation6 + $0x54] ss:$8 sps:$4 sm:$0xff]   ;;  %v669_v12 = vld [vmem:[#allocation6 + $0x50] ss:$8 sps:$4 sm:$0xff]   ;;  %v670_v13 = vld [vmem:[#allocation6 + $0x64] ss:$8 sps:$4 sm:$0xff]  }
  0x3c   :  { %v672_v14 = vld [vmem:[#allocation6 + $0x60] ss:$8 sps:$4 sm:$0xff]   ;;  %v673_v15 = vld [vmem:[#allocation6 + $0x74] ss:$8 sps:$4 sm:$0xff]   ;;  %v675_v16 = vld [vmem:[#allocation6 + $0x70] ss:$8 sps:$4 sm:$0xff]  }
  0x3d   :  { %182 = vmatpush1.bf16.msra.mxu0 %v657_v4  ;;  %v677_v18 = vld [vmem:[#allocation8 + $0x40] sm:$0xff]   ;;  %v679_v20 = vld [vmem:[#allocation8 + $0x48] sm:$0xff]   ;;  %v681_v22 = vld [vmem:[#allocation8 + $0x50] sm:$0xff]   ;;  %s802_s23 = smov [#allocation9]  }
  0x3e   :  { %183 = vmatprep.subr.bf16.mxu0 %v658_v5  ;;  %v678_v19 = vld [vmem:[#allocation8] sm:$0xff]   ;;  %620 = vmatprep.subr.bf16.mxu1 %v677_v18  ;;  %v680_v21 = vld [vmem:[#allocation8 + $0x8] sm:$0xff]   ;;  %v682_v23 = vld [vmem:[#allocation8 + $0x10] sm:$0xff]   ;;  %v273_v18 = vlaneseq  ;;  %s574_s24 = sshll.u32 %s802_s23, 4  ;;  %s575_s24 = int_to_ptr.vmem [resolvable:$true] %s574_s24 }
  0x3f   :  { %621 = vmatpush3.bf16.msra.mxu1 %v678_v19  ;;  %v683_v24 = vld [vmem:[#allocation8 + $0x58] sm:$0xff]   ;;  %v685_v26 = vld [vmem:[#allocation8 + $0x60] sm:$0xff]   ;;  %v687_v28 = vld [vmem:[#allocation8 + $0x68] sm:$0xff]   ;;  %p770_p11 = scmp.lt.s32.totalorder %s575_s24, %s575_s24 }
  0x40   :  { %622 = vmatprep.subr.bf16.mxu1 %v679_v20  ;;  %v684_v25 = vld [vmem:[#allocation8 + $0x18] sm:$0xff]   ;;  %v686_v27 = vld [vmem:[#allocation8 + $0x20] sm:$0xff]   ;;  %v688_v29 = vld [vmem:[#allocation8 + $0x28] sm:$0xff]   ;;  %v274_v20 = vshrl.u32 %v273_v18, 7 }
  0x41   :  { %184 = vmatpush1.bf16.msra.mxu0 %v660_v6  ;;  %v689_v30 = vld [vmem:[#allocation8 + $0x70] sm:$0xff]   ;;  %v691_v32 = vld [vmem:[#allocation8 + $0x78] sm:$0xff]  }
  0x42   :  { %185 = vmatprep.subr.bf16.mxu0 %v661_v7  ;;  %v690_v31 = vld [vmem:[#allocation8 + $0x30] sm:$0xff]   ;;  %v692_v33 = vld [vmem:[#allocation8 + $0x38] sm:$0xff]  }
  0x43   :  { %623 = vmatpush3.bf16.msra.mxu1 %v680_v21 }
  0x44   :  { %624 = vmatprep.subr.bf16.mxu1 %v681_v22 }
  0x45   :  { %186 = vmatpush1.bf16.msra.mxu0 %v663_v8 }
  0x46   :  { %187 = vmatprep.subr.bf16.mxu0 %v664_v9 }
  0x47   :  { %625 = vmatpush3.bf16.msra.mxu1 %v682_v23 }
  0x48   :  { %626 = vmatprep.subr.bf16.mxu1 %v683_v24 }
  0x49   :  { %188 = vmatpush1.bf16.msra.mxu0 %v666_v10 }
  0x4a   :  { %189 = vmatprep.subr.bf16.mxu0 %v667_v11 }
  0x4b   :  { %627 = vmatpush3.bf16.msra.mxu1 %v684_v25 }
  0x4c   :  { %628 = vmatprep.subr.bf16.mxu1 %v685_v26  ;;  %v262_v26 = vld [vmem:[%s935_s2] sm:$0x3] }
  0x4d   :  { %190 = vmatpush1.bf16.msra.mxu0 %v669_v12 }
  0x4e   :  { %191 = vmatprep.subr.bf16.mxu0 %v670_v13 }
  0x4f   :  { %629 = vmatpush3.bf16.msra.mxu1 %v686_v27 }
  0x50   :  { %630 = vmatprep.subr.bf16.mxu1 %v687_v28  ;;  %v900_v28 = vsub.s32 0, %v274_v20 }
  0x51   :  { %192 = vmatpush1.bf16.msra.mxu0 %v672_v14 }
  0x52   :  { %193 = vmatprep.subr.bf16.mxu0 %v673_v15 }
  0x53   :  { %631 = vmatpush3.bf16.msra.mxu1 %v688_v29  ;;  %v294_v29 = vsub.s32 1, %v274_v20 }
  0x54   :  { %632 = vmatprep.subr.bf16.mxu1 %v689_v30 }
  0x55   :  { %194 = vmatpush1.bf16.msra.mxu0 %v675_v16  ;;  %v801_v16 = vmov 1966171168  }
  0x57   :  { %633 = vmatpush3.bf16.msra.mxu1 %v690_v31 }
  0x58   :  { %212 = vmatmul.mubr.bf16.vlgmr.msra.gmra.mrb[0].mxu0 %v676_v17  ;;  %634 = vmatprep.subr.bf16.mxu1 %v691_v32  ;;  %v271_v17 = vunpack.c.l.s4 %v801_v16 }
  0x5a   :  { %v272_v19 = vunpack.c.0.s8 %v271_v17 }
  0x5b   :  { %635 = vmatpush3.bf16.msra.mxu1 %v692_v33 }
  0x5c   :  { %v275_v22 = vsub.s32 %v272_v19, %v274_v20  ;;  %v544_v19 = vld [vmem:[%s938_s5] sm:$0x1]  ;;  %s765_s5 = scalar_lea.vmem %s575_s24, 256 }
  0x5d   :  { %p766_p10 = scmp.ne.s32.totalorder %s575_s24, %s765_s5  ;;  %p771_p12 = scmp.lt.s32.totalorder %s765_s5, %s765_s5 }
  0x5f   :  { %p772_p13 = por %p771_p12, %p770_p11 }
  0x61   :  { %p773_p0 = pnand %p772_p13, %p766_p10 }
 0x12b   :  { %v882_v34 = vpop.f32.mrb[0].mxu0 }
 0x12c   :  { %v884_v35 = vpop.f32.mrb[1].mxu0  ;;  %v236_v37 = vmul.f32 %v882_v34, %v882_v34 }
 0x12d   :  { %v886_v36 = vpop.f32.mrb[2].mxu0  ;;  %v237_v41 = vmul.f32 %v884_v35, %v884_v35 }
 0x12e   :  { %v222_v38 = vadd.f32 %v886_v36, %v882_v34  ;;  %v238_v39 = vmul.f32 %v886_v36, %v886_v36  ;;  %v219_v40 = vpop.f32.mrb[3].mxu0 }
 0x12f   :  { %v229_v42 = vadd.f32 %v219_v40, %v884_v35  ;;  %v239_v43 = vmul.f32 %v219_v40, %v219_v40 }
 0x130   :  { %v223_v44 = vrot.slane %v222_v38, 4  ;;  %v240_v45 = vadd.f32 %v238_v39, %v236_v37 }
 0x131   :  { %v230_v46 = vrot.slane %v229_v42, 4  ;;  %v247_v47 = vadd.f32 %v239_v43, %v237_v41 }
 0x132   :  { %v224_v48 = vadd.f32 %v223_v44, %v222_v38  ;;  %v241_v49 = vrot.slane %v240_v45, 4 }
 0x133   :  { %v231_v50 = vadd.f32 %v230_v46, %v229_v42  ;;  %v248_v51 = vrot.slane %v247_v47, 4 }
 0x134   :  { %v225_v52 = vrot.slane %v224_v48, 2  ;;  %v242_v53 = vadd.f32 %v241_v49, %v240_v45  ;;  %v286_v45 = vld [vmem:[%s936_s3] sm:$0x3] }
 0x135   :  { %v232_v54 = vrot.slane %v231_v50, 2  ;;  %v249_v55 = vadd.f32 %v248_v51, %v247_v47 }
 0x136   :  { %v226_v56 = vadd.f32 %v225_v52, %v224_v48  ;;  %v243_v57 = vrot.slane %v242_v53, 2 }
 0x137   :  { %v233_v58 = vadd.f32 %v232_v54, %v231_v50  ;;  %v250_v59 = vrot.slane %v249_v55, 2 }
 0x138   :  { %v227_v60 = vrot.slane %v226_v56, 1  ;;  %v244_v61 = vadd.f32 %v243_v57, %v242_v53 }
 0x139   :  { %v234_v62 = vrot.slane %v233_v58, 1  ;;  %v251_v63 = vadd.f32 %v250_v59, %v249_v55 }
 0x13a   :  { %v228_v0 = vadd.f32 %v227_v60, %v226_v56  ;;  %v245_v1 = vrot.slane %v244_v61, 1 }
 0x13b   :  { %v235_v2 = vadd.f32 %v234_v62, %v233_v58  ;;  %v252_v3 = vrot.slane %v251_v63, 1 }
 0x13c   :  { %v246_v4 = vadd.f32 %v245_v1, %v244_v61  ;;  %v254_v5 = vmul.f32 0.0625, %v228_v0 }
 0x13d   :  { %v253_v6 = vadd.f32 %v252_v3, %v251_v63  ;;  %v255_v7 = vmul.f32 0.0625, %v235_v2 }
 0x13e   :  { %v256_v8 = vmul.f32 0.0625, %v246_v4  ;;  %v258_v9 = vmul.f32 %v254_v5, %v254_v5 }
 0x13f   :  { %v257_v10 = vmul.f32 0.0625, %v253_v6  ;;  %v259_v11 = vmul.f32 %v255_v7, %v255_v7 }
 0x140   :  { %v260_v12 = vsub.f32 %v256_v8, %v258_v9 }
 0x141   :  { %v261_v13 = vsub.f32 %v257_v10, %v259_v11 }
 0x142   :  { %v263_v14 = vadd.f32 1e-05, %v260_v12 }
 0x143   :  { %v264_v15 = vadd.f32 1e-05, %v261_v13 }
 0x144   :  { %693 = vrsqrt.f32 %v263_v14 }
 0x145   :  { %695 = vrsqrt.f32 %v264_v15 }
 0x14e   :  { %v694_v21 = vpop.eup %693 }
 0x14f   :  { %v696_v23 = vpop.eup %695 }
 0x150   :  { %v269_v24 = vcombine.low %v694_v21, %v696_v23 }
 0x152   :  { %v276_v25 = vrot.slane %v269_v24, %v275_v22 }
 0x154   :  { %v283_v27 = vrot.slane %v276_v25, %v275_v22 }
 0x156   :  { %v285_v30 = vmul.f32 %v283_v27, %v262_v26 }
 0x158   :  { %v291_v31 = vrot.slane %v285_v30, %v900_v28  ;;  %v295_v32 = vrot.slane %v285_v30, %v294_v29 }
 0x15a   :  { %v298_v33 = vmul.f32 %v291_v31, %v254_v5  ;;  %v299_v37 = vmul.f32 %v295_v32, %v255_v7  ;;  %v322_v38 = vmul.f32 %v295_v32, %v219_v40  ;;  %v320_v39 = vmul.f32 %v295_v32, %v884_v35 }
 0x15b   :  { %v319_v41 = vmul.f32 %v291_v31, %v882_v34  ;;  %v321_v42 = vmul.f32 %v291_v31, %v886_v36 }
 0x15c   :  { %v302_v43 = vcombine.low %v298_v33, %v299_v37 }
 0x15e   :  { %v309_v44 = vrot.slane %v302_v43, %v275_v22 }
 0x160   :  { %v316_v46 = vrot.slane %v309_v44, %v275_v22  ;;  %v548_v22 = vld [vmem:[%s939_s6] sm:$0x1] }
 0x162   :  { %v318_v47 = vsub.f32 %v286_v45, %v316_v46 }
 0x164   :  { %v331_v48 = vrot.slane %v318_v47, %v294_v29  ;;  %v327_v49 = vrot.slane %v318_v47, %v900_v28 }
 0x166   :  { %v335_v50 = vadd.f32 %v331_v48, %v320_v39  ;;  %v337_v51 = vadd.f32 %v331_v48, %v322_v38  ;;  %v334_v40 = vadd.f32 %v327_v49, %v319_v41  ;;  %v336_v52 = vadd.f32 %v327_v49, %v321_v42 }
 0x168   :  { %v339_v35 = vmax.f32 %v335_v50, 0.0  ;;  %v341_v53 = vmax.f32 %v337_v51, 0.0  ;;  %v338_v34 = vmax.f32 %v334_v40, 0.0  ;;  %v340_v54 = vmax.f32 %v336_v52, 0.0 }
 0x16a   :  { %v345_v36 = vpack.c.bf16 %v341_v53, %v339_v35  ;;  %v344_v55 = vpack.c.bf16 %v340_v54, %v338_v34 }
 0x16c   :  { %506 = vmatprep.mubr.bf16.mxu1 %v345_v36 }
 0x16d   :  { %507 = vmatmul.mubr.bf16.vlgmr.msra.gmra.mrb[0].mxu1 %v344_v55 }
 0x240   :  { %v636_v56 = vpop.f32.mrb[0].mxu1 }
 0x241   :  { %v637_v57 = vpop.f32.mrb[1].mxu1 }
 0x242   :  { %v638_v58 = vadd.f32 %v637_v57, %v636_v56  ;;  %v639_v59 = vpop.f32.mrb[2].mxu1 }
 0x243   :  { %v640_v60 = vpop.f32.mrb[3].mxu1 }
 0x244   :  { %v641_v61 = vadd.f32 %v640_v60, %v639_v59  ;;  %v531_v62 = vmul.f32 %v638_v58, %v638_v58 }
 0x246   :  { %v524_v63 = vadd.f32 %v641_v61, %v638_v58  ;;  %v532_v0 = vmul.f32 %v641_v61, %v641_v61 }
 0x248   :  { %v525_v1 = vrot.slane %v524_v63, 4  ;;  %v533_v2 = vadd.f32 %v532_v0, %v531_v62 }
 0x24a   :  { %v526_v3 = vadd.f32 %v525_v1, %v524_v63  ;;  %v534_v4 = vrot.slane %v533_v2, 4 }
 0x24c   :  { %v527_v5 = vrot.slane %v526_v3, 2  ;;  %v535_v6 = vadd.f32 %v534_v4, %v533_v2 }
 0x24e   :  { %v528_v7 = vadd.f32 %v527_v5, %v526_v3  ;;  %v536_v8 = vrot.slane %v535_v6, 2 }
 0x250   :  { %v529_v9 = vrot.slane %v528_v7, 1  ;;  %v537_v10 = vadd.f32 %v536_v8, %v535_v6 }
 0x252   :  { %v530_v11 = vadd.f32 %v529_v9, %v528_v7  ;;  %v538_v12 = vrot.slane %v537_v10, 1 }
 0x254   :  { %v539_v13 = vadd.f32 %v538_v12, %v537_v10  ;;  %v540_v14 = vmul.f32 0.0625, %v530_v11 }
 0x256   :  { %v541_v15 = vmul.f32 0.0625, %v539_v13  ;;  %v542_v16 = vmul.f32 %v540_v14, %v540_v14 }
 0x258   :  { %v543_v17 = vsub.f32 %v541_v15, %v542_v16 }
 0x25a   :  { %v545_v18 = vadd.f32 1e-05, %v543_v17 }
 0x25c   :  { %697 = vrsqrt.f32 %v545_v18 }
 0x266   :  { %v698_v20 = vpop.eup %697 }
 0x267   :  { %v547_v21 = vmul.f32 %v698_v20, %v544_v19 }
 0x269   :  { %v549_v23 = vmul.f32 %v547_v21, %v540_v14  ;;  %v555_v24 = vrot.slane %v547_v21, %v900_v28 }
 0x26b   :  { %v558_v25 = vmul.f32 %v641_v61, %v555_v24  ;;  %v550_v26 = vsub.f32 %v548_v22, %v549_v23  ;;  %v557_v27 = vmul.f32 %v638_v58, %v555_v24 }
 0x26d   :  { %v563_v29 = vrot.slane %v550_v26, %v900_v28 }
 0x26f   :  { %v565_v30 = vadd.f32 %v563_v29, %v557_v27  ;;  %v566_v31 = vadd.f32 %v563_v29, %v558_v25 }
 0x271   :  { %567 = vst [vmem:[#allocation9] sm:$0xff] %v565_v30  ;;  %568 = vst [vmem:[#allocation9 + $0x8] sm:$0xff] %v566_v31 }
 0x272   :  { %776 = shalt.err (!%p773_p0)
}
 0x273   :  { %s777_s25 = scalar_lea.hbm %s940_s7, 256 }
 0x274   :  { %p778_p1 = scmp.ne.s32.totalorder %s940_s7, %s777_s25  ;;  %p781_p2 = scmp.lt.u32.totalorder %s777_s25, %s940_s7 }
 0x276   :  { %p783_p3 = pnand %p781_p2, %p778_p1 }
 0x278   :  { %786 = shalt.err (!%p783_p3)
}
 0x279   :  { %580 = dma.vmem_to_hbm [thread:$0]  %s575_s24, 256, %s940_s7, [#allocation5], %s794_s11, %s794_s11, %s795_s12  }
 0x27a   :  { %791 = dma.done.wait [#allocation5], 256  }
 0x27b   :  { %792 = vsyncadd [#allocation5], 4294967040 }
 0x27c   :  { %584 = vsyncpa [#allocation4], 1 }
 0x27d   :  { %585 = vsyncpa [#allocation7], 1 }
 0x27e   :  { %586 = vsyncpa [#allocation5], 1 }

</bundles_post_ra>
